<compile_context>
chip_gen: v5e
topology: v5e:2x2
jax: 0.10.0
libtpu: 0.0.40
codegen_flags: <defaults>
</compile_context>

<pallas_src>
import numpy as np
import jax
import jax.numpy as jnp
from jax.experimental import pallas as pl
from jax.experimental.pallas import tpu as pltpu

# ---------------------------------------------------------------------------
# Label / distance-matrix setup (COVID-challenge label semantics: 'unknown'
# has zero distance to everything, so it contributes no Wasserstein error).
# ---------------------------------------------------------------------------
LABELS = {'lung': 1, 'lesion': 2, 'unknown': 3, 'background': 0}
NUM_CLASSES = 4
UNKNOWN = LABELS['unknown']
LANES = 128

# Distance matrix M over labels [background, lung, lesion, unknown].
# TODO(synk): the exact dist_matrix / weighting_mode passed via gwdl_kwargs is
# not shown in the snippet; this matrix + foreground alpha mirror the bundled
# JAX reference below.
_M = np.array([[0.0, 1.0, 1.0, 0.0],
               [1.0, 0.0, 0.5, 0.0],
               [1.0, 0.5, 0.0, 0.0],
               [0.0, 0.0, 0.0, 0.0]], dtype=np.float32)

# GWDL alpha weighting: 1 for foreground classes, 0 for background.
_ALPHA = np.array([0.0, 1.0, 1.0, 1.0], dtype=np.float32)

_EPS = float(np.spacing(1))  # same epsilon as the reference torch implementation


# ---------------------------------------------------------------------------
# Pallas kernel: accumulates per-(batch, chunk) loss statistics over row tiles.
# Output rows: [generalized_TP, total_wasserstein_error, sum(CE*mask), sum(mask)]
# broadcast over 128 lanes (lane-dense unmasked store, written once).
# ---------------------------------------------------------------------------
def _loss_stats_kernel(logits_ref, tgt_ref, out_ref,
                       tp_acc, err_acc, ce_acc, msk_acc):
    s = pl.program_id(2)

    @pl.when(s == 0)
    def _():
        tp_acc[...] = jnp.zeros_like(tp_acc)
        err_acc[...] = jnp.zeros_like(err_acc)
        ce_acc[...] = jnp.zeros_like(ce_acc)
        msk_acc[...] = jnp.zeros_like(msk_acc)

    # Dense (rows, 128) class planes -> full 8x128 vreg occupancy.
    ls = [logits_ref[0, c].astype(jnp.float32) for c in range(NUM_CLASSES)]
    tgt = tgt_ref[0, 0].astype(jnp.int32)          # int8 in HBM/VMEM, i32 compute

    # Class-unrolled, numerically stable softmax pieces (C = 4 static):
    # no one-hot, no sublane reductions, a single reciprocal per voxel.
    m = jnp.maximum(jnp.maximum(ls[0], ls[1]), jnp.maximum(ls[2], ls[3]))
    es = [jnp.exp(l - m) for l in ls]
    denom = es[0] + es[1] + es[2] + es[3]
    r = pl.reciprocal(denom, approx=True)          # EUP slot
    inv = r * (2.0 - denom * r)                    # one Newton step -> ~f32 exact
    lse = m + jnp.log(denom)                       # (rows, 128)

    # "target == label" masks, computed once and reused everywhere.
    is_l = [tgt == lbl for lbl in range(NUM_CLASSES)]

    # Per-voxel cross entropy: logsumexp(logits) - logit[target], masked so that
    # 'unknown' voxels and the -1 padding contribute nothing.
    logit_true = jnp.where(is_l[0], ls[0],
                 jnp.where(is_l[1], ls[1],
                 jnp.where(is_l[2], ls[2],
                 jnp.where(is_l[3], ls[3], 0.0))))
    mask = jnp.logical_and(tgt >= 0, jnp.logical_not(is_l[UNKNOWN]))
    mask = mask.astype(jnp.float32)
    ce = (lse - logit_true) * mask

    # Per-voxel Wasserstein distance: sum_c M[target, c] * softmax_c, with the
    # numerator built from unnormalized exps (one reciprocal at the end).
    wass_num = jnp.zeros_like(lse)
    for lbl in range(NUM_CLASSES):
        row = None
        for c in range(NUM_CLASSES):
            w = float(_M[lbl, c])
            if w == 0.0:
                continue
            term = es[c] if w == 1.0 else w * es[c]
            row = term if row is None else row + term
        if row is not None:
            wass_num = jnp.where(is_l[lbl], row, wass_num)
    wass = wass_num * inv

    # ALPHA = [0, 1, 1, 1]: a single compare replaces the select chain, and the
    # -1 padding label is excluded automatically.
    alpha_t = (tgt >= 1).astype(jnp.float32)

    # Reduce this tile's rows (sublane axis) before touching the accumulators:
    # one tiny (1, 128) read-modify-write per statistic per tile.
    tp_acc[...] += jnp.sum(alpha_t * (1.0 - wass), axis=0, keepdims=True)
    err_acc[...] += jnp.sum(wass, axis=0, keepdims=True)
    ce_acc[...] += jnp.sum(ce, axis=0, keepdims=True)
    msk_acc[...] += jnp.sum(mask, axis=0, keepdims=True)

    @pl.when(s == pl.num_programs(2) - 1)
    def _():
        sums = jnp.concatenate(
            [jnp.sum(tp_acc[...], axis=-1, keepdims=True),
             jnp.sum(err_acc[...], axis=-1, keepdims=True),
             jnp.sum(ce_acc[...], axis=-1, keepdims=True),
             jnp.sum(msk_acc[...], axis=-1, keepdims=True)], axis=0)   # (4, 1)
        out_ref[0, 0] = jnp.broadcast_to(sums, (4, LANES))


# ---------------------------------------------------------------------------
# Wrapper: GWDL_and_CE_loss forward (aggregate='sum', reduction='mean')
# ---------------------------------------------------------------------------
def gwdl_and_ce_loss(net_output, target, weight_ce=1.0, weight_gwdl=1.0,
                     rows_per_tile=None, num_chunks=None):
    B, C, H, W = net_output.shape
    assert C == NUM_CLASSES, "kernel is specialized for 4 classes"
    S = H * W
    R = pl.cdiv(S, LANES)                          # spatial rows of 128 voxels

    # Megacore: the batch axis is already parallel; add a spatial-chunk axis
    # when an odd/single batch would otherwise idle the second TensorCore.
    if num_chunks is None:
        num_chunks = 2 if (B % 2 == 1 and R >= 64) else 1

    # Tile size: target ~64K voxels per grid step so the ~0.35us per-step
    # overhead stays well hidden; rows are a multiple of 32 (int8 target
    # sublane tiling) unless the block spans the full (padded) row extent.
    if rows_per_tile is None:
        rows_per_tile = 512
    rows_per_chunk = pl.cdiv(R, num_chunks)
    if rows_per_chunk <= rows_per_tile:
        align = 8 if num_chunks == 1 else 32
        rows_per_tile = pl.cdiv(rows_per_chunk, align) * align
        tiles_per_chunk = 1
    else:
        rows_per_tile = max(32, (rows_per_tile // 32) * 32)
        tiles_per_chunk = pl.cdiv(rows_per_chunk, rows_per_tile)
    R_pad = num_chunks * tiles_per_chunk * rows_per_tile
    S_pad = R_pad * LANES

    # Keep the caller's logits dtype for the DMA (bf16 inputs halve HBM
    # traffic; the kernel upcasts to f32).  Labels fit in int8 (1 B/voxel)
    # and the -1 padding sentinel survives the cast.
    logits = net_output.reshape(B, C, S)
    tgt = target.reshape(B, 1, S).astype(jnp.int8)
    if S_pad != S:
        logits = jnp.pad(logits, ((0, 0), (0, 0), (0, S_pad - S)))
        tgt = jnp.pad(tgt, ((0, 0), (0, 0), (0, S_pad - S)), constant_values=-1)
    logits = logits.reshape(B, C, R_pad, LANES)
    tgt = tgt.reshape(B, 1, R_pad, LANES)

    # VMEM budget from the real block sizes: double-buffered inputs + ~20 live
    # f32 per-voxel intermediates + headroom, capped for v7x's 64 MiB VMEM.
    lane_elems = rows_per_tile * LANES
    logits_blk = C * lane_elems * logits.dtype.itemsize
    tgt_blk = lane_elems                           # int8
    interm = 20 * lane_elems * 4
    vmem_limit = int(min(32 * 1024 * 1024,
                         max(16 * 1024 * 1024,
                             2 * (logits_blk + tgt_blk) + interm + (4 << 20))))

    tpc = tiles_per_chunk

    out = pl.pallas_call(
        _loss_stats_kernel,
        out_shape=jax.ShapeDtypeStruct((B, num_chunks, 4, LANES), jnp.float32),
        grid_spec=pltpu.PrefetchScalarGridSpec(
            num_scalar_prefetch=0,
            grid=(B, num_chunks, tiles_per_chunk),
            in_specs=[
                pl.BlockSpec((1, C, rows_per_tile, LANES),
                             lambda b, n, s: (b, 0, n * tpc + s, 0)),
                pl.BlockSpec((1, 1, rows_per_tile, LANES),
                             lambda b, n, s: (b, 0, n * tpc + s, 0)),
            ],
            out_specs=pl.BlockSpec((1, 1, 4, LANES),
                                   lambda b, n, s: (b, n, 0, 0)),
            scratch_shapes=[pltpu.VMEM((1, LANES), jnp.float32),
                            pltpu.VMEM((1, LANES), jnp.float32),
                            pltpu.VMEM((1, LANES), jnp.float32),
                            pltpu.VMEM((1, LANES), jnp.float32)],
        ),
        compiler_params=pltpu.CompilerParams(
            dimension_semantics=("parallel", "parallel", "arbitrary"),
            vmem_limit_bytes=vmem_limit),
    )(logits, tgt)

    stats = jnp.sum(out[..., 0], axis=1)           # (B, 4): combine chunk partials
    tp = stats[:, 0]
    all_err = stats[:, 1]
    ce_sum = stats[:, 2]
    mask_sum = stats[:, 3]

    # Generalized Wasserstein Dice Loss (mean over batch).
    wass_dice = (2.0 * tp + _EPS) / (2.0 * tp + all_err + _EPS)
    gwdl = jnp.mean(1.0 - wass_dice)

    # Masked cross entropy ('unknown' voxels excluded), mean over kept voxels.
    # TODO(synk): the exact masked-CE normalization of the challenge's
    # CrossentropyND(loss_mask=...) is not shown in the snippet; masked mean
    # (sum(ce*mask)/sum(mask)) is implemented here.
    ce = jnp.sum(ce_sum) / jnp.sum(mask_sum)

    return weight_ce * ce + weight_gwdl * gwdl


# ---------------------------------------------------------------------------
# Pure-JAX reference (mirrors the PyTorch GWDL + masked CE semantics)
# ---------------------------------------------------------------------------
def _reference(net_output, target, weight_ce=1.0, weight_gwdl=1.0):
    B, C, H, W = net_output.shape
    logits = net_output.reshape(B, C, -1).astype(jnp.float32)
    tgt = target.reshape(B, -1).astype(jnp.int32)

    probs = jax.nn.softmax(logits, axis=1)
    onehot = jax.nn.one_hot(tgt, C, axis=1, dtype=jnp.float32)     # (B, C, S)

    M = jnp.asarray(_M)
    Mrow = jnp.einsum('bls,lc->bcs', onehot, M)
    wass = jnp.sum(Mrow * probs, axis=1)                           # (B, S)
    alpha_t = jnp.einsum('bls,l->bs', onehot, jnp.asarray(_ALPHA))
    tp = jnp.sum(alpha_t * (1.0 - wass), axis=1)
    all_err = jnp.sum(wass, axis=1)
    gwdl = jnp.mean(1.0 - (2.0 * tp + _EPS) / (2.0 * tp + all_err + _EPS))

    logp = jax.nn.log_softmax(logits, axis=1)
    ce = -jnp.sum(onehot * logp, axis=1)
    mask = (tgt != UNKNOWN).astype(jnp.float32)
    ce_loss = jnp.sum(ce * mask) / jnp.sum(mask)

    return weight_ce * ce_loss + weight_gwdl * gwdl


if __name__ == "__main__":
    key = jax.random.PRNGKey(0)
    k1, k2, k3, k4 = jax.random.split(key, 4)

    # Case 1: small single-tile path (B=2, C=4, 16x16), even batch -> no chunking.
    B, C, H, W = 2, 4, 16, 16
    net_output = jax.random.normal(k1, (B, C, H, W), dtype=jnp.float32)
    target = jax.random.randint(k2, (B, 1, H, W), 0, NUM_CLASSES, dtype=jnp.int32)

    loss = gwdl_and_ce_loss(net_output, target)
    jax.block_until_ready(loss)
    ref = _reference(net_output, target)
    assert np.isfinite(float(loss))
    assert abs(float(loss) - float(ref)) < 1e-4, (float(loss), float(ref))

    # Case 2: odd batch -> 2 parallel chunks, multiple row tiles per chunk,
    # padded tail (-1 labels) and the int8 target path.
    B2, H2, W2 = 1, 96, 96
    net_output2 = jax.random.normal(k3, (B2, C, H2, W2), dtype=jnp.float32)
    target2 = jax.random.randint(k4, (B2, 1, H2, W2), 0, NUM_CLASSES, dtype=jnp.int32)

    loss2 = gwdl_and_ce_loss(net_output2, target2, rows_per_tile=32)
    jax.block_until_ready(loss2)
    ref2 = _reference(net_output2, target2)
    assert np.isfinite(float(loss2))
    assert abs(float(loss2) - float(ref2)) < 1e-4, (float(loss2), float(ref2))

    print("KERNEL_OK")
</pallas_src>

<mosaic_0001>
module attributes {stable_mosaic.version = 11 : i64} {
  func.func @_loss_stats_kernel(%arg0: i32, %arg1: i32, %arg2: i32, %arg3: memref<1x4x8x128xf32, #tpu.memory_space<vmem>>, %arg4: memref<1x1x8x128xi8, #tpu.memory_space<vmem>>, %arg5: memref<1x1x4x128xf32, #tpu.memory_space<vmem>>, %arg6: memref<1x128xf32, #tpu.memory_space<vmem>>, %arg7: memref<1x128xf32, #tpu.memory_space<vmem>>, %arg8: memref<1x128xf32, #tpu.memory_space<vmem>>, %arg9: memref<1x128xf32, #tpu.memory_space<vmem>>) attributes {dimension_semantics = [#tpu.dimension_semantics<parallel>, #tpu.dimension_semantics<parallel>, #tpu.dimension_semantics<arbitrary>], iteration_bounds = array<i64: 2, 1, 1>, scalar_prefetch = 0 : i64, scratch_operands = 4 : i64, tpu.core_type = #tpu.core_type<tc>, window_params = [{transform_indices = @transform_0, window_bounds = array<i64: 1, 4, 8, 128>}, {transform_indices = @transform_1, window_bounds = array<i64: 1, 1, 8, 128>}, {transform_indices = @transform_2, window_bounds = array<i64: 1, 1, 4, 128>}]} {
    %c0_i32 = arith.constant 0 : i32
    %0 = arith.cmpi eq, %arg2, %c0_i32 : i32
    %1 = arith.extui %0 : i1 to i32
    %c0_i32_0 = arith.constant 0 : i32
    %2 = arith.cmpi ne, %1, %c0_i32_0 : i32
    scf.if %2 {
      %cst_48 = arith.constant 0.000000e+00 : f32
      %98 = vector.broadcast %cst_48 : f32 to vector<1x128xf32>
      %c0_49 = arith.constant 0 : index
      %c0_50 = arith.constant 0 : index
      %99 = vector.load %arg6[%c0_49, %c0_50] : memref<1x128xf32, #tpu.memory_space<vmem>>, vector<1x128xf32>
      tpu.vector_store %arg6[%c0_49, %c0_50], %98 {strides = array<i32>} : memref<1x128xf32, #tpu.memory_space<vmem>>, vector<1x128xf32>,
      %cst_51 = arith.constant 0.000000e+00 : f32
      %100 = vector.broadcast %cst_51 : f32 to vector<1x128xf32>
      %c0_52 = arith.constant 0 : index
      %c0_53 = arith.constant 0 : index
      %101 = vector.load %arg7[%c0_52, %c0_53] : memref<1x128xf32, #tpu.memory_space<vmem>>, vector<1x128xf32>
      tpu.vector_store %arg7[%c0_52, %c0_53], %100 {strides = array<i32>} : memref<1x128xf32, #tpu.memory_space<vmem>>, vector<1x128xf32>,
      %cst_54 = arith.constant 0.000000e+00 : f32
      %102 = vector.broadcast %cst_54 : f32 to vector<1x128xf32>
      %c0_55 = arith.constant 0 : index
      %c0_56 = arith.constant 0 : index
      %103 = vector.load %arg8[%c0_55, %c0_56] : memref<1x128xf32, #tpu.memory_space<vmem>>, vector<1x128xf32>
      tpu.vector_store %arg8[%c0_55, %c0_56], %102 {strides = array<i32>} : memref<1x128xf32, #tpu.memory_space<vmem>>, vector<1x128xf32>,
      %cst_57 = arith.constant 0.000000e+00 : f32
      %104 = vector.broadcast %cst_57 : f32 to vector<1x128xf32>
      %c0_58 = arith.constant 0 : index
      %c0_59 = arith.constant 0 : index
      %105 = vector.load %arg9[%c0_58, %c0_59] : memref<1x128xf32, #tpu.memory_space<vmem>>, vector<1x128xf32>
      tpu.vector_store %arg9[%c0_58, %c0_59], %104 {strides = array<i32>} : memref<1x128xf32, #tpu.memory_space<vmem>>, vector<1x128xf32>,
    } else {
    }
    %c0 = arith.constant 0 : index
    %c0_1 = arith.constant 0 : index
    %c0_2 = arith.constant 0 : index
    %c0_3 = arith.constant 0 : index
    %3 = vector.load %arg3[%c0, %c0_1, %c0_2, %c0_3] : memref<1x4x8x128xf32, #tpu.memory_space<vmem>>, vector<1x1x8x128xf32>
    %4 = vector.shape_cast %3 : vector<1x1x8x128xf32> to vector<8x128xf32>
    %c0_4 = arith.constant 0 : index
    %c1 = arith.constant 1 : index
    %c0_5 = arith.constant 0 : index
    %c0_6 = arith.constant 0 : index
    %5 = vector.load %arg3[%c0_4, %c1, %c0_5, %c0_6] : memref<1x4x8x128xf32, #tpu.memory_space<vmem>>, vector<1x1x8x128xf32>
    %6 = vector.shape_cast %5 : vector<1x1x8x128xf32> to vector<8x128xf32>
    %c0_7 = arith.constant 0 : index
    %c2 = arith.constant 2 : index
    %c0_8 = arith.constant 0 : index
    %c0_9 = arith.constant 0 : index
    %7 = vector.load %arg3[%c0_7, %c2, %c0_8, %c0_9] : memref<1x4x8x128xf32, #tpu.memory_space<vmem>>, vector<1x1x8x128xf32>
    %8 = vector.shape_cast %7 : vector<1x1x8x128xf32> to vector<8x128xf32>
    %c0_10 = arith.constant 0 : index
    %c3 = arith.constant 3 : index
    %c0_11 = arith.constant 0 : index
    %c0_12 = arith.constant 0 : index
    %9 = vector.load %arg3[%c0_10, %c3, %c0_11, %c0_12] : memref<1x4x8x128xf32, #tpu.memory_space<vmem>>, vector<1x1x8x128xf32>
    %10 = vector.shape_cast %9 : vector<1x1x8x128xf32> to vector<8x128xf32>
    %c0_13 = arith.constant 0 : index
    %c0_14 = arith.constant 0 : index
    %c0_15 = arith.constant 0 : index
    %c0_16 = arith.constant 0 : index
    %11 = vector.load %arg4[%c0_13, %c0_14, %c0_15, %c0_16] : memref<1x1x8x128xi8, #tpu.memory_space<vmem>>, vector<1x1x8x128xi8>
    %12 = vector.shape_cast %11 : vector<1x1x8x128xi8> to vector<8x128xi8>
    %13 = arith.extsi %12 : vector<8x128xi8> to vector<8x128xi32>
    %14 = arith.maximumf %4, %6 : vector<8x128xf32>
    %15 = arith.maximumf %8, %10 : vector<8x128xf32>
    %16 = arith.maximumf %14, %15 : vector<8x128xf32>
    %17 = arith.subf %4, %16 : vector<8x128xf32>
    %18 = math.exp %17 : vector<8x128xf32>
    %19 = arith.subf %6, %16 : vector<8x128xf32>
    %20 = math.exp %19 : vector<8x128xf32>
    %21 = arith.subf %8, %16 : vector<8x128xf32>
    %22 = math.exp %21 : vector<8x128xf32>
    %23 = arith.subf %10, %16 : vector<8x128xf32>
    %24 = math.exp %23 : vector<8x128xf32>
    %25 = arith.addf %18, %20 : vector<8x128xf32>
    %26 = arith.addf %25, %22 : vector<8x128xf32>
    %27 = arith.addf %26, %24 : vector<8x128xf32>
    %28 = tpu.reciprocal %27 {approx = true} : vector<8x128xf32> -> vector<8x128xf32>
    %29 = arith.mulf %27, %28 : vector<8x128xf32>
    %cst = arith.constant 2.000000e+00 : f32
    %30 = vector.broadcast %cst : f32 to vector<8x128xf32>
    %31 = arith.subf %30, %29 : vector<8x128xf32>
    %32 = arith.mulf %28, %31 : vector<8x128xf32>
    %33 = math.log %27 : vector<8x128xf32>
    %34 = arith.addf %16, %33 : vector<8x128xf32>
    %c0_i32_17 = arith.constant 0 : i32
    %35 = vector.broadcast %c0_i32_17 : i32 to vector<8x128xi32>
    %36 = arith.cmpi eq, %13, %35 : vector<8x128xi32>
    %c1_i32 = arith.constant 1 : i32
    %37 = vector.broadcast %c1_i32 : i32 to vector<8x128xi32>
    %38 = arith.cmpi eq, %13, %37 : vector<8x128xi32>
    %c2_i32 = arith.constant 2 : i32
    %39 = vector.broadcast %c2_i32 : i32 to vector<8x128xi32>
    %40 = arith.cmpi eq, %13, %39 : vector<8x128xi32>
    %c3_i32 = arith.constant 3 : i32
    %41 = vector.broadcast %c3_i32 : i32 to vector<8x128xi32>
    %42 = arith.cmpi eq, %13, %41 : vector<8x128xi32>
    %cst_18 = arith.constant 0.000000e+00 : f32
    %43 = vector.broadcast %cst_18 : f32 to vector<8x128xf32>
    %44 = arith.select %42, %10, %43 : vector<8x128xi1>, vector<8x128xf32>
    %45 = arith.select %40, %8, %44 : vector<8x128xi1>, vector<8x128xf32>
    %46 = arith.select %38, %6, %45 : vector<8x128xi1>, vector<8x128xf32>
    %47 = arith.select %36, %4, %46 : vector<8x128xi1>, vector<8x128xf32>
    %c0_i32_19 = arith.constant 0 : i32
    %48 = vector.broadcast %c0_i32_19 : i32 to vector<8x128xi32>
    %49 = arith.cmpi sge, %13, %48 : vector<8x128xi32>
    %cst_20 = arith.constant dense<true> : vector<8x128xi1>
    %50 = arith.xori %42, %cst_20 : vector<8x128xi1>
    %51 = arith.andi %49, %50 : vector<8x128xi1>
    %52 = arith.extui %51 : vector<8x128xi1> to vector<8x128xi32>
    %53 = arith.sitofp %52 : vector<8x128xi32> to vector<8x128xf32>
    %54 = arith.subf %34, %47 : vector<8x128xf32>
    %55 = arith.mulf %54, %53 : vector<8x128xf32>
    %cst_21 = arith.constant 0.000000e+00 : f32
    %56 = vector.broadcast %cst_21 : f32 to vector<8x128xf32>
    %57 = arith.addf %20, %22 : vector<8x128xf32>
    %58 = arith.select %36, %57, %56 : vector<8x128xi1>, vector<8x128xf32>
    %cst_22 = arith.constant 5.000000e-01 : f32
    %59 = vector.broadcast %cst_22 : f32 to vector<8x128xf32>
    %60 = arith.mulf %59, %22 : vector<8x128xf32>
    %61 = arith.addf %18, %60 : vector<8x128xf32>
    %62 = arith.select %38, %61, %58 : vector<8x128xi1>, vector<8x128xf32>
    %cst_23 = arith.constant 5.000000e-01 : f32
    %63 = vector.broadcast %cst_23 : f32 to vector<8x128xf32>
    %64 = arith.mulf %63, %20 : vector<8x128xf32>
    %65 = arith.addf %18, %64 : vector<8x128xf32>
    %66 = arith.select %40, %65, %62 : vector<8x128xi1>, vector<8x128xf32>
    %67 = arith.mulf %66, %32 : vector<8x128xf32>
    %c1_i32_24 = arith.constant 1 : i32
    %68 = vector.broadcast %c1_i32_24 : i32 to vector<8x128xi32>
    %69 = arith.cmpi sge, %13, %68 : vector<8x128xi32>
    %70 = arith.extui %69 : vector<8x128xi1> to vector<8x128xi32>
    %71 = arith.sitofp %70 : vector<8x128xi32> to vector<8x128xf32>
    %c0_25 = arith.constant 0 : index
    %c0_26 = arith.constant 0 : index
    %72 = vector.load %arg6[%c0_25, %c0_26] : memref<1x128xf32, #tpu.memory_space<vmem>>, vector<1x128xf32>
    %cst_27 = arith.constant 1.000000e+00 : f32
    %73 = vector.broadcast %cst_27 : f32 to vector<8x128xf32>
    %74 = arith.subf %73, %67 : vector<8x128xf32>
    %75 = arith.mulf %71, %74 : vector<8x128xf32>
    %cst_28 = arith.constant dense<0.000000e+00> : vector<128xf32>
    %76 = vector.multi_reduction <add>, %75, %cst_28 [0] : vector<8x128xf32> to vector<128xf32>
    %77 = vector.shape_cast %76 : vector<128xf32> to vector<1x128xf32>
    %78 = arith.addf %72, %77 : vector<1x128xf32>
    %c0_29 = arith.constant 0 : index
    %c0_30 = arith.constant 0 : index
    %79 = vector.load %arg6[%c0_29, %c0_30] : memref<1x128xf32, #tpu.memory_space<vmem>>, vector<1x128xf32>
    tpu.vector_store %arg6[%c0_29, %c0_30], %78 {strides = array<i32>} : memref<1x128xf32, #tpu.memory_space<vmem>>, vector<1x128xf32>,
    %c0_31 = arith.constant 0 : index
    %c0_32 = arith.constant 0 : index
    %80 = vector.load %arg7[%c0_31, %c0_32] : memref<1x128xf32, #tpu.memory_space<vmem>>, vector<1x128xf32>
    %cst_33 = arith.constant dense<0.000000e+00> : vector<128xf32>
    %81 = vector.multi_reduction <add>, %67, %cst_33 [0] : vector<8x128xf32> to vector<128xf32>
    %82 = vector.shape_cast %81 : vector<128xf32> to vector<1x128xf32>
    %83 = arith.addf %80, %82 : vector<1x128xf32>
    %c0_34 = arith.constant 0 : index
    %c0_35 = arith.constant 0 : index
    %84 = vector.load %arg7[%c0_34, %c0_35] : memref<1x128xf32, #tpu.memory_space<vmem>>, vector<1x128xf32>
    tpu.vector_store %arg7[%c0_34, %c0_35], %83 {strides = array<i32>} : memref<1x128xf32, #tpu.memory_space<vmem>>, vector<1x128xf32>,
    %c0_36 = arith.constant 0 : index
    %c0_37 = arith.constant 0 : index
    %85 = vector.load %arg8[%c0_36, %c0_37] : memref<1x128xf32, #tpu.memory_space<vmem>>, vector<1x128xf32>
    %cst_38 = arith.constant dense<0.000000e+00> : vector<128xf32>
    %86 = vector.multi_reduction <add>, %55, %cst_38 [0] : vector<8x128xf32> to vector<128xf32>
    %87 = vector.shape_cast %86 : vector<128xf32> to vector<1x128xf32>
    %88 = arith.addf %85, %87 : vector<1x128xf32>
    %c0_39 = arith.constant 0 : index
    %c0_40 = arith.constant 0 : index
    %89 = vector.load %arg8[%c0_39, %c0_40] : memref<1x128xf32, #tpu.memory_space<vmem>>, vector<1x128xf32>
    tpu.vector_store %arg8[%c0_39, %c0_40], %88 {strides = array<i32>} : memref<1x128xf32, #tpu.memory_space<vmem>>, vector<1x128xf32>,
    %c0_41 = arith.constant 0 : index
    %c0_42 = arith.constant 0 : index
    %90 = vector.load %arg9[%c0_41, %c0_42] : memref<1x128xf32, #tpu.memory_space<vmem>>, vector<1x128xf32>
    %cst_43 = arith.constant dense<0.000000e+00> : vector<128xf32>
    %91 = vector.multi_reduction <add>, %53, %cst_43 [0] : vector<8x128xf32> to vector<128xf32>
    %92 = vector.shape_cast %91 : vector<128xf32> to vector<1x128xf32>
    %93 = arith.addf %90, %92 : vector<1x128xf32>
    %c0_44 = arith.constant 0 : index
    %c0_45 = arith.constant 0 : index
    %94 = vector.load %arg9[%c0_44, %c0_45] : memref<1x128xf32, #tpu.memory_space<vmem>>, vector<1x128xf32>
    tpu.vector_store %arg9[%c0_44, %c0_45], %93 {strides = array<i32>} : memref<1x128xf32, #tpu.memory_space<vmem>>, vector<1x128xf32>,
    %c0_i32_46 = arith.constant 0 : i32
    %95 = arith.cmpi eq, %arg2, %c0_i32_46 : i32
    %96 = arith.extui %95 : i1 to i32
    %c0_i32_47 = arith.constant 0 : i32
    %97 = arith.cmpi ne, %96, %c0_i32_47 : i32
    scf.if %97 {
      %c0_48 = arith.constant 0 : index
      %c0_49 = arith.constant 0 : index
      %98 = vector.load %arg6[%c0_48, %c0_49] : memref<1x128xf32, #tpu.memory_space<vmem>>, vector<1x128xf32>
      %cst_50 = arith.constant dense<0.000000e+00> : vector<1xf32>
      %99 = vector.multi_reduction <add>, %98, %cst_50 [1] : vector<1x128xf32> to vector<1xf32>
      %100 = vector.shape_cast %99 : vector<1xf32> to vector<1x1xf32>
      %c0_51 = arith.constant 0 : index
      %c0_52 = arith.constant 0 : index
      %101 = vector.load %arg7[%c0_51, %c0_52] : memref<1x128xf32, #tpu.memory_space<vmem>>, vector<1x128xf32>
      %cst_53 = arith.constant dense<0.000000e+00> : vector<1xf32>
      %102 = vector.multi_reduction <add>, %101, %cst_53 [1] : vector<1x128xf32> to vector<1xf32>
      %103 = vector.shape_cast %102 : vector<1xf32> to vector<1x1xf32>
      %c0_54 = arith.constant 0 : index
      %c0_55 = arith.constant 0 : index
      %104 = vector.load %arg8[%c0_54, %c0_55] : memref<1x128xf32, #tpu.memory_space<vmem>>, vector<1x128xf32>
      %cst_56 = arith.constant dense<0.000000e+00> : vector<1xf32>
      %105 = vector.multi_reduction <add>, %104, %cst_56 [1] : vector<1x128xf32> to vector<1xf32>
      %106 = vector.shape_cast %105 : vector<1xf32> to vector<1x1xf32>
      %c0_57 = arith.constant 0 : index
      %c0_58 = arith.constant 0 : index
      %107 = vector.load %arg9[%c0_57, %c0_58] : memref<1x128xf32, #tpu.memory_space<vmem>>, vector<1x128xf32>
      %cst_59 = arith.constant dense<0.000000e+00> : vector<1xf32>
      %108 = vector.multi_reduction <add>, %107, %cst_59 [1] : vector<1x128xf32> to vector<1xf32>
      %109 = vector.shape_cast %108 : vector<1xf32> to vector<1x1xf32>
      %110 = tpu.concatenate %100, %103, %106, %109 in 0 : vector<1x1xf32>, vector<1x1xf32>, vector<1x1xf32>, vector<1x1xf32> -> vector<4x1xf32>
      %111 = vector.shape_cast %110 : vector<4x1xf32> to vector<4x1xf32>
      %112 = vector.broadcast %111 : vector<4x1xf32> to vector<4x128xf32>
      %c0_60 = arith.constant 0 : index
      %c0_61 = arith.constant 0 : index
      %c0_62 = arith.constant 0 : index
      %c0_63 = arith.constant 0 : index
      %113 = vector.load %arg5[%c0_60, %c0_61, %c0_62, %c0_63] : memref<1x1x4x128xf32, #tpu.memory_space<vmem>>, vector<1x1x4x128xf32>
      %114 = vector.shape_cast %113 : vector<1x1x4x128xf32> to vector<4x128xf32>
      %115 = vector.shape_cast %112 : vector<4x128xf32> to vector<1x1x4x128xf32>
      tpu.vector_store %arg5[%c0_60, %c0_61, %c0_62, %c0_63], %115 {strides = array<i32>} : memref<1x1x4x128xf32, #tpu.memory_space<vmem>>, vector<1x1x4x128xf32>,
    } else {
    }
    return
  }
  func.func @transform_0(%arg0: i32, %arg1: i32, %arg2: i32) -> (i32, i32, i32, i32) {
    %c1_i32 = arith.constant 1 : i32
    %0 = arith.muli %arg1, %c1_i32 : i32
    %1 = arith.addi %0, %arg2 : i32
    %c0_i32 = arith.constant 0 : i32
    %c0_i32_0 = arith.constant 0 : i32
    %c0_i32_1 = arith.constant 0 : i32
    return %arg0, %c0_i32, %1, %c0_i32_0 : i32, i32, i32, i32
  }
  func.func @transform_1(%arg0: i32, %arg1: i32, %arg2: i32) -> (i32, i32, i32, i32) {
    %c1_i32 = arith.constant 1 : i32
    %0 = arith.muli %arg1, %c1_i32 : i32
    %1 = arith.addi %0, %arg2 : i32
    %c0_i32 = arith.constant 0 : i32
    %c0_i32_0 = arith.constant 0 : i32
    %c0_i32_1 = arith.constant 0 : i32
    return %arg0, %c0_i32, %1, %c0_i32_0 : i32, i32, i32, i32
  }
  func.func @transform_2(%arg0: i32, %arg1: i32, %arg2: i32) -> (i32, i32, i32, i32) {
    %c0_i32 = arith.constant 0 : i32
    %c0_i32_0 = arith.constant 0 : i32
    %c0_i32_1 = arith.constant 0 : i32
    return %arg0, %arg1, %c0_i32, %c0_i32_0 : i32, i32, i32, i32
  }
}

</mosaic_0001>

<bundles_post_ra>
// kernel: tpu_custom_call.1
= control target key start
LH: loop header
LB: loop body
LE: loop exit
PB: predicated region body
PF: predicated region fallthrough
CT: control target
= control target key end

     0   :  { %7 = vsyncpa [#allocation7], 0  ;;  %s950_s0 = inlined_call_operand.hbm [shape: f32[2,4,8,128], index: 0, kind: input, shape index: {}]   ;;  %s951_s1 = inlined_call_operand.hbm [shape: s8[2,1,8,128], index: 1, kind: input, shape index: {}]   ;;  %s952_s2 = inlined_call_operand.hbm [shape: f32[2,1,4,128], index: 2, kind: output, shape index: {}]  }
   0x1   :  { %9 = vsyncpa [#allocation7 + $0x1], 0 }
   0x2   :  { %10 = vsyncpa [#allocation10], 0 }
   0x3   :  { %12 = vsyncpa [#allocation10 + $0x1], 0 }
   0x4   :  { %13 = vsyncpa [#allocation8], 0 }
   0x5   :  { %15 = vsyncpa [#allocation8 + $0x1], 0  ;;  %s789_s9 = smov 0   ;;  %s791_s10 = smov 0  }
   0x6   :  { %s793_s11 = smov 0   ;;  %s795_s12 = smov 0  }
   0x7   :  { %s797_s13 = smov 0   ;;  %s799_s14 = smov 0  }
   0x8 LB: > { %s512_s15 = sadd.s32 4294967295, %s767_s14   ;;  %s513_s16 = sadd.s32 4294967294, %s767_s14   ;;  %s767_s14 = sphi %s799_s14, %s21_s14   ;;  %s763_s13 = sphi %s797_s13, %s962_s13   ;;  %s759_s12 = sphi %s795_s12, %s961_s12   ;;  %s755_s11 = sphi %s793_s11, %s960_s11   ;;  %s751_s10 = sphi %s791_s10, %s959_s10   ;;  %s747_s9 = sphi %s789_s9, %s958_s9  }
   0x9   : > { %s40_s17 = sadd.s32 1, %s763_s13  ;;  %s51_s18 = sadd.s32 1, %s755_s11 }
   0xa   : > { %p42_p0 = scmp.ge.s32.totalorder %s40_s17, 2  ;;  %p58_p1 = scmp.ne.s32.totalorder %s755_s11, %s751_s10 }
   0xb   : > { %p59_p2 = scmp.eq.s32.totalorder %s767_s14, 0  ;;  %p64_p3 = scmp.ne.s32.totalorder %s751_s10, %s747_s9 }
   0xc   : > { %s964_s17 = smov (%p42_p0, %s40_s17), 0  ;;  %p65_p5 = scmp.eq.s32.totalorder %s512_s15, 0 }
   0xd   : > { %p830_p4 = por %p59_p2, %p58_p1  ;;  %s46_s20 = ssub.s32 %s763_s13, %s964_s17 }
   0xe   : > { %p120_p6 = scmp.eq.s32.totalorder %s512_s15, 1  ;;  %p49_p7 = scmp.eq.s32.totalorder %s46_s20, 0 }
   0xf   : > { %p836_p8 = por %p65_p5, %p64_p3  ;;  %p126_p10 = scmp.eq.s32.totalorder %s513_s16, 1 }
  0x10   : > { %p840_p9 = por %p120_p6, %p58_p1  ;;  %p515_p12 = scmp.ge.s32.totalorder %s767_s14, 2 }
  0x11   : > { %s845_s23 = scalar_select %p49_p7, %s755_s11, %s51_s18  }
  0x12   : > { %p847_p11 = por %p126_p10, %p64_p3  ;;  %p552_p13 = scmp.lt.s32.totalorder %s767_s14, 2 }
  0x13   : > { %s146_s25 = sand.u32 1, %s755_s11   ;;  %s534_s27 = sshll.u32 %s763_s13, 5 }
  0x14   : > { %s516_s26 = sshll.u32 %s146_s25, 5  ;;  %s157_s30 = scalar_lea.hbm %s950_s0, %s534_s27 }
  0x15   : > { %s150_s3 = scalar_lea.vmem [#allocation6], %s516_s26  ;;  %s158_s5 = sshll.u32 %s157_s30, 4  ;;  %s159_s5 = int_to_ptr.hbm [resolvable:$true] %s158_s5 }
  0x16   : > { %s160_s4 = sshll.u32 %s150_s3, 4  ;;  %p860_p0 = pnand %p552_p13, %p830_p4  ;;  %s161_s4 = int_to_ptr.vmem [resolvable:$true] %s160_s4 }
  0x17   : > { %p521_p1 = scmp.ge.s32.totalorder %s767_s14, 1  ;;  %s147_s7 = scalar_lea.sflag [#allocation7], %s146_s25 }
  0x18   : > { %s769_s8 = smov 128   ;;  %s770_s15 = smov 8  }
  0x19   : > { %544 = dma.hbm_to_vmem [thread:$0]  (!%p860_p0), %s159_s5, 512, %s161_s4, %s147_s7, %s769_s8, %s769_s8, %s770_s15  }
  0x1a   : > { %p189_p2 = scmp.lt.s32.totalorder %s767_s14, 3  ;;  %s519_s16 = sshll.u32 %s146_s25, 1 }
  0x1b   : > { %s520_s18 = sshll.u32 %s763_s13, 1  ;;  %s174_s27 = scalar_lea.vmem [#allocation9], %s519_s16 }
  0x1c   : > { %p190_p3 = pnand %p521_p1, %p189_p2  ;;  %s180_s19 = scalar_lea.hbm %s951_s1, %s520_s18 }
  0x1d   : > { %s184_s28 = sshll.u32 %s174_s27, 4  ;;  %s182_s29 = sshll.u32 %s180_s19, 4  ;;  %s185_s28 = int_to_ptr.vmem [resolvable:$true] %s184_s28  ;;  %s183_s29 = int_to_ptr.hbm [resolvable:$true] %s182_s29 }
  0x1e   : > { %s171_s30 = scalar_lea.sflag [#allocation10], %s146_s25  ;;  %193 = sbr.rel (%p190_p3) target bundleno = 326 (0x146), region = 28 }
  0x1f   : > { %547 = dma.hbm_to_vmem [thread:$0]  (!%p860_p0), %s183_s29, 32, %s185_s28, %s171_s30  }
  0x20   : > { %s875_s3 = sand.u32 (!%p190_p3), 1, %s751_s10  }
  0x21   : > { %s522_s4 = sshll.u32 (!%p190_p3), %s875_s3, 5  ;;  %s196_s5 = scalar_lea.sflag (!%p190_p3), [#allocation7], %s875_s3 }
  0x22   : > { %s199_s7 = scalar_lea.vmem (!%p190_p3), [#allocation6], %s522_s4 }
  0x23   : > { %734 = dma.done.wait (%p836_p8), %s196_s5, 512  }
  0x24   : > { %736 = vsyncadd (%p836_p8), %s196_s5, 4294966784  ;;  %s523_s25 = sshll.u32 %s875_s3, 1  ;;  %s206_s6 = scalar_lea.sflag [#allocation10], %s875_s3 }
  0x25   : > { %s209_s8 = scalar_lea.vmem [#allocation9], %s523_s25 }
  0x26   : > { %738 = dma.done.wait (%p836_p8), %s206_s6, 32  }
  0x27   : > { %740 = vsyncadd (%p836_p8), %s206_s6, 4294967264  ;;  %v771_v0 = vmov 0.0   ;;  %v893_v1 = vld [vmem:[%s199_s7] sm:$0xff]  ;;  %v525_v2 = vld [vmem:[%s199_s7 + $0x8] sm:$0xff]  ;;  %vm772_vm2 = vmmov 1   ;;  %vm349_vm9 = vcmask 1040384  }
  0x28   : > { %243 = vst [vmem:[#allocation3] sm:$0x1] %v771_v0  ;;  %v526_v3 = vld [vmem:[%s199_s7 + $0x10] sm:$0xff]  ;;  %v527_v4 = vld [vmem:[%s199_s7 + $0x18] sm:$0xff]  ;;  %v255_v5 = vmax.f32 %v893_v1, %v525_v2  ;;  %v253_v8 = vld [vmem:[%s209_s8] sm:$0x3] }
  0x29   : > { %242 = vst [vmem:[#allocation2] sm:$0x1] %v771_v0  ;;  %v256_v6 = vmax.f32 %v526_v3, %v527_v4  ;;  %v254_v16 = vunpack.c.0.s8 %v253_v8  ;;  %vm375_vm10 = vcmask 1041408   ;;  %vm377_vm11 = vcmask 1042432   ;;  %s524_s21 = sshll.u32 %s875_s3, 2  ;;  %s531_s15 = sshll.u32 %s759_s12, 2 }
  0x2a   : > { %244 = vst [vmem:[#allocation4] sm:$0x1] %v771_v0  ;;  %s397_s20 = scalar_lea.hbm %s952_s2, %s531_s15  ;;  %s235_s26 = scalar_lea.vmem [#allocation11], %s524_s21 }
  0x2b   : > { %245 = vst [vmem:[#allocation5] sm:$0x1] %v771_v0  ;;  %v257_v7 = vmax.f32 %v255_v5, %v256_v6  ;;  %vm283_vm0 = vcmp.eq.s32.totalorder %v254_v16, 3  ;;  %vm288_vm1 = vcmp.ge.s32.totalorder %v254_v16, 0  ;;  %vm280_vm5 = vcmp.eq.s32.totalorder %v254_v16, 0  ;;  %s399_s19 = sshll.u32 %s235_s26, 4  ;;  %s400_s19 = int_to_ptr.vmem [resolvable:$true] %s399_s19 }
  0x2c   : > { %vm289_vm3 = vmxor %vm283_vm0, %vm772_vm2  ;;  %v284_v31 = vsel %vm283_vm0, %v527_v4, 0.0  ;;  %vm282_vm6 = vcmp.eq.s32.totalorder %v254_v16, 2  ;;  %vm281_vm7 = vcmp.eq.s32.totalorder %v254_v16, 1  ;;  %vm304_vm8 = vcmp.ge.s32.totalorder %v254_v16, 1  ;;  %s401_s27 = sshll.u32 %s397_s20, 4  ;;  %s386_s28 = scalar_lea.sflag [#allocation8], %s875_s3  ;;  %s402_s27 = int_to_ptr.hbm [resolvable:$true] %s401_s27 }
  0x2d   : > { %v258_v9 = vsub.f32 %v893_v1, %v257_v7  ;;  %v261_v10 = vsub.f32 %v525_v2, %v257_v7  ;;  %v264_v11 = vsub.f32 %v526_v3, %v257_v7  ;;  %v267_v12 = vsub.f32 %v527_v4, %v257_v7  ;;  %vm290_vm4 = vmand %vm288_vm1, %vm289_vm3  ;;  %s695_s29 = sshra.s32 %s402_s27, 4  ;;  %s701_s5 = scalar_lea.hbm %s952_s2, 8  ;;  %s696_s29 = int_to_ptr.hbm [resolvable:$true] %s695_s29 }
  0x2e   : > { %v528_v22 = vsel %vm290_vm4, 1.0, %v771_v0  ;;  %v285_v35 = vsel %vm282_vm6, %v526_v3, %v284_v31  ;;  %v529_v55 = vsel %vm304_vm8, 1.0, %v771_v0  ;;  %s697_s30 = scalar_lea.hbm %s696_s29, 4  ;;  %p702_p7 = scmp.lt.s32.totalorder %s696_s29, %s952_s2 }
  0x2f   : > { %v259_v13 = vmul.f32 1.442695, %v258_v9  ;;  %v262_v14 = vmul.f32 1.442695, %v261_v10  ;;  %v265_v15 = vmul.f32 1.442695, %v264_v11  ;;  %v286_v41 = vsel %vm281_vm7, %v525_v2, %v285_v35  ;;  %p698_p4 = scmp.ne.s32.totalorder %s696_s29, %s697_s30  ;;  %p703_p8 = scmp.lt.s32.totalorder %s701_s5, %s697_s30 }
  0x30   : > { %v268_v17 = vmul.f32 1.442695, %v267_v12  ;;  %v337_v24 = vrot.slane %v528_v22, 4  ;;  %v287_v49 = vsel %vm280_vm5, %v893_v1, %v286_v41  ;;  %v318_v8 = vld [vmem:[#allocation3] sm:$0x1] }
  0x31   : > { %609 = vpow2.f32 %v259_v13  ;;  %v327_v0 = vld [vmem:[#allocation4] sm:$0x1]  ;;  %p699_p5 = pnand %p698_p4, %p840_p9  ;;  %p704_p10 = por %p703_p8, %p702_p7 }
  0x32   : > { %611 = vpow2.f32 %v262_v14  ;;  %v338_v26 = vadd.f32 %v528_v22, %v337_v24  ;;  %v336_v42 = vld [vmem:[#allocation5] sm:$0x1] }
  0x33   : > { %613 = vpow2.f32 %v265_v15  ;;  %v307_v15 = vld [vmem:[#allocation2] sm:$0x1]  ;;  %p700_p6 = pneg %p699_p5 }
  0x34   : > { %615 = vpow2.f32 %v268_v17  ;;  %v339_v29 = vrot.slane %v338_v26, 2 }
  0x35   : > { %p705_p13 = pnand %p704_p10, %p700_p6 }
  0x36   : > { %v340_v32 = vadd.f32 %v339_v29, %v338_v26 }
  0x37   : > { %v610_v18 = vpop.eup %609 }
  0x38   : > { %v612_v19 = vpop.eup %611  ;;  %v341_v36 = vrot.slane %v340_v32, 1 }
  0x39   : > { %v614_v20 = vpop.eup %613  ;;  %v270_v21 = vadd.f32 %v612_v19, %v610_v18  ;;  %v300_v33 = vmul.f32 0.5, %v612_v19 }
  0x3a   : > { %v616_v23 = vpop.eup %615  ;;  %v297_v28 = vmul.f32 0.5, %v614_v20  ;;  %v295_v30 = vadd.f32 %v614_v20, %v612_v19  ;;  %v342_v38 = vadd.f32 %v341_v36, %v340_v32 }
  0x3b   : > { %v271_v25 = vadd.f32 %v614_v20, %v270_v21  ;;  %v301_v40 = vadd.f32 %v610_v18, %v300_v33 }
  0x3c   : > { %v298_v34 = vadd.f32 %v610_v18, %v297_v28  ;;  %v296_v37 = vsel %vm280_vm5, %v295_v30, 0.0  ;;  %v343_v46 = vadd.f32 %v342_v38, %v336_v42 }
  0x3d   : > { %v272_v27 = vadd.f32 %v616_v23, %v271_v25 }
  0x3e   : > { %v299_v45 = vsel %vm281_vm7, %v298_v34, %v296_v37  ;;  %344 = vst [vmem:[#allocation5] sm:$0x1] %v343_v46 }
  0x3f   : > { %617 = vrcp.f32 %v272_v27  ;;  %v302_v50 = vsel %vm282_vm6, %v301_v40, %v299_v45 }
  0x40   : > { %619 = vlog2.f32 %v272_v27 }
  0x45   : > { %v618_v39 = vpop.eup %617  ;;  %v361_v25 = vld [vmem:[#allocation5] sm:$0x1] }
  0x46   : > { %v620_v43 = vpop.eup %619  ;;  %v274_v44 = vmul.f32 %v618_v39, %v272_v27  ;;  %v362_v26 = vsel %vm349_vm9, %v361_v25, 0.0  ;;  %v773_v27 = vmov 0  }
  0x47   : > { %v278_v47 = vmul.f32 0.6931472, %v620_v43  ;;  %607 = vset.pattern.permute.xlu2 %v773_v27  ;;  %608 = vset.pattern.permute.xlu0 %v773_v27 }
  0x48   : > { %v275_v48 = vsub.f32 2.0, %v274_v44 }
  0x49   : > { %v279_v51 = vadd.f32 %v278_v47, %v257_v7 }
  0x4a   : > { %v276_v52 = vmul.f32 %v618_v39, %v275_v48 }
  0x4b   : > { %v293_v53 = vsub.f32 %v279_v51, %v287_v49 }
  0x4c   : > { %v303_v54 = vmul.f32 %v302_v50, %v276_v52 }
  0x4d   : > { %v294_v56 = vmul.f32 %v528_v22, %v293_v53 }
  0x4e   : > { %v319_v57 = vrot.slane %v303_v54, 4  ;;  %v308_v58 = vsub.f32 1.0, %v303_v54 }
  0x4f   : > { %v328_v59 = vrot.slane %v294_v56, 4 }
  0x50   : > { %v320_v60 = vadd.f32 %v319_v57, %v303_v54  ;;  %v309_v61 = vmul.f32 %v529_v55, %v308_v58 }
  0x51   : > { %v329_v62 = vadd.f32 %v328_v59, %v294_v56 }
  0x52   : > { %v321_v63 = vrot.slane %v320_v60, 2  ;;  %v310_v2 = vrot.slane %v309_v61, 4 }
  0x53   : > { %v330_v1 = vrot.slane %v329_v62, 2 }
  0x54   : > { %v322_v3 = vadd.f32 %v321_v63, %v320_v60  ;;  %v311_v4 = vadd.f32 %v310_v2, %v309_v61 }
  0x55   : > { %v331_v5 = vadd.f32 %v330_v1, %v329_v62 }
  0x56   : > { %v323_v6 = vrot.slane %v322_v3, 1  ;;  %v312_v7 = vrot.slane %v311_v4, 2 }
  0x57   : > { %v332_v9 = vrot.slane %v331_v5, 1 }
  0x58   : > { %v324_v10 = vadd.f32 %v323_v6, %v322_v3  ;;  %v313_v11 = vadd.f32 %v312_v7, %v311_v4 }
  0x59   : > { %v333_v12 = vadd.f32 %v332_v9, %v331_v5 }
  0x5a   : > { %v325_v13 = vadd.f32 %v324_v10, %v318_v8  ;;  %v314_v14 = vrot.slane %v313_v11, 1 }
  0x5b   : > { %v334_v16 = vadd.f32 %v333_v12, %v327_v0 }
  0x5c   : > { %326 = vst [vmem:[#allocation3] sm:$0x1] %v325_v13  ;;  %v315_v17 = vadd.f32 %v314_v14, %v313_v11 }
  0x5d   : > { %335 = vst [vmem:[#allocation4] sm:$0x1] %v334_v16 }
  0x5e   : > { %v316_v18 = vadd.f32 %v315_v17, %v307_v15 }
  0x60   : > { %317 = vst [vmem:[#allocation2] sm:$0x1] %v316_v18 }
  0x63   : > { %v353_v19 = vld [vmem:[#allocation3] sm:$0x1] }
  0x64   : > { %v354_v20 = vsel %vm349_vm9, %v353_v19, 0.0  ;;  %v357_v22 = vld [vmem:[#allocation4] sm:$0x1] }
  0x65   : > { %355 = vadd.xlane.f32.xlu0 %v354_v20  ;;  %v358_v24 = vsel %vm349_vm9, %v357_v22, 0.0 }
  0x67   : > { %v348_v21 = vld [vmem:[#allocation2] sm:$0x1] }
  0x68   : > { %v350_v23 = vsel %vm349_vm9, %v348_v21, 0.0 }
  0x69   : > { %351 = vadd.xlane.f32.xlu1 %v350_v23 }
  0x6d   : > { %359 = vadd.xlane.f32.xlu0 %v358_v24 }
  0x71   : > { %363 = vadd.xlane.f32.xlu1 %v362_v26 }
  0xd8   : > { %v356_v28 = vpop.xlane.xlu0 %355 }
  0xd9   : > { %v366_v31 = vrot.slane %v356_v28, 7 }
  0xdc   : > { %v352_v29 = vpop.xlane.xlu1 %351 }
  0xdd   : > { %v374_v34 = vsel %vm349_vm9, %v352_v29, %v366_v31 }
  0xe0   : > { %v360_v30 = vpop.xlane.xlu0 %359 }
  0xe1   : > { %v369_v32 = vrot.slane %v360_v30, 6 }
  0xe3   : > { %v376_v36 = vsel %vm375_vm10, %v374_v34, %v369_v32 }
  0xe4   : > { %v364_v33 = vpop.xlane.xlu1 %363 }
  0xe5   : > { %v372_v35 = vrot.slane %v364_v33, 5 }
  0xe7   : > { %v378_v37 = vsel %vm377_vm11, %v376_v36, %v372_v35 }
  0xe8   : > { %381 = vperm.xlu2 %607, %v378_v37  }
 0x142   : > { %v382_v38 = vpop.permute.xlu2 %381 }
 0x143   : > { %384 = vst [vmem:[%s235_s26] sm:$0xf] %v382_v38 }
 0x144   : > { %708 = shalt.err (!%p705_p13)
}
 0x145   : > { %539 = dma.vmem_to_hbm [thread:$0]  (%p840_p9), %s400_s19, 64, %s402_s27, %s386_s28  }
 0x146 PF: > { %s413_s3 = sand.u32 1, %s747_s9   ;;  %p549_p0 = pnand %p515_p12, %p847_p11 }
 0x147   : > { %s414_s6 = scalar_lea.sflag [#allocation8], %s413_s3 }
 0x148   : > { %p550_p1 = pneg %p549_p0 }
 0x14a   : > { %742 = dma.done.wait (%p550_p1), %s414_s6, 64  }
 0x14b   : > { %744 = vsyncadd (%p550_p1), %s414_s6, 4294967232  ;;  %s21_s14 = sadd.s32 1, %s767_s14   ;;  %s958_s9 = smov %s751_s10 }
 0x14c   : > { %p18_p2 = scmp.ge.s32.totalorder %s21_s14, 4   ;;  %s959_s10 = smov %s755_s11 }
 0x14d   : > { %s960_s11 = smov %s845_s23  ;;  %s961_s12 = smov %s763_s13 }
 0x14e   : > { %s962_s13 = smov %s964_s17  ;;  %20 = sbr.rel (!%p18_p2) target bundleno = 8 (0x8), region = 97 }
 0x153   :  { %420 = vsyncpa [#allocation7], 1 }
 0x154   :  { %422 = vsyncpa [#allocation7 + $0x1], 1 }
 0x155   :  { %423 = vsyncpa [#allocation10], 1 }
 0x156   :  { %425 = vsyncpa [#allocation10 + $0x1], 1 }
 0x157   :  { %426 = vsyncpa [#allocation8], 1 }
 0x158   :  { %428 = vsyncpa [#allocation8 + $0x1], 1 }

</bundles_post_ra>
